<compile_context>
chip_gen: v7x
topology: tpu7x:2x2x1
jax: 0.10.0
libtpu: 0.0.40
codegen_flags: <defaults>
</compile_context>

<pallas_src>
import functools

import jax
import jax.numpy as jnp
from jax.experimental import pallas as pl
from jax.experimental.pallas import tpu as pltpu


_LANE = 128


def _vmem_budget_and_limit():
    """Returns (pipeline VMEM budget bytes, vmem_limit_bytes) per TPU generation."""
    kind = ""
    try:
        kind = jax.devices()[0].device_kind.lower()
    except Exception:
        pass
    if "v7" in kind or "tpu7" in kind:
        # v7x: only 64 MiB VMEM per TensorCore -> stay well under it.
        return 28 << 20, 48 << 20
    # v5e / v6e: 128 MiB physical VMEM (scoped default is much lower, so we
    # raise vmem_limit_bytes explicitly).
    return 56 << 20, 96 << 20


def _select_tiling(n, f_eff, itemsize, vmem_budget):
    """Pick (tile_f, n_blk).  n_blk == n means the whole batch axis is resident."""

    def fits(rows, lanes):
        # double-buffered input tile (native dtype) + ~2 f32 working copies in
        # the kernel body, plus a few f32 rows for accumulators / output.
        per_tile = rows * lanes * (2 * itemsize + 2 * 4)
        scratch = 6 * lanes * 4
        return per_tile + scratch <= vmem_budget

    # Preferred: whole batch resident per tile (two-pass, best numerics).
    for lanes in (2048, 1024, 512, 256, 128):
        lanes = min(lanes, f_eff)
        if fits(n, lanes):
            tile_f = lanes
            # keep >= 2 grid steps along F when F is large so the "parallel"
            # axis can be sharded across v7x's 2 TensorCores.
            if tile_f >= f_eff and f_eff >= 1024:
                tile_f = _LANE * pl.cdiv(f_eff // _LANE, 2)
            return tile_f, n

    # Large batch: block the batch axis and accumulate sum / sum-of-squares.
    for lanes in (1024, 512, 256, 128):
        lanes = min(lanes, f_eff)
        rows = (vmem_budget - 6 * lanes * 4) // (lanes * (2 * itemsize + 2 * 4))
        rows = (rows // 16) * 16          # sublane-friendly for f32 and bf16
        rows = min(rows, n)
        if rows >= 16:
            if lanes >= f_eff and f_eff >= 1024:
                lanes = _LANE * pl.cdiv(f_eff // _LANE, 2)
            return lanes, rows
    return _LANE, 8   # last resort (tiny VMEM budget)


def _var_kernel_full_batch(x_ref, o_ref, *, inv_n):
    # x_ref: (N, tile_f) -- full batch axis resident; two-pass variance.
    x = x_ref[...].astype(jnp.float32)
    mean = jnp.sum(x, axis=0, keepdims=True) * inv_n
    diff = x - mean
    var = jnp.sum(diff * diff, axis=0, keepdims=True) * inv_n
    o_ref[...] = var.astype(o_ref.dtype)


def _var_kernel_blocked_batch(x_ref, o_ref, sum_ref, sumsq_ref, *,
                              inv_n, n_total, n_blk):
    # x_ref: (n_blk, tile_f).  Grid axis 1 (last, "arbitrary") walks the batch
    # axis; sum / sum-of-squares accumulate in VMEM scratch, the variance is
    # finalized on the last step:  var = E[x^2] - E[x]^2   (f32 accumulation).
    k = pl.program_id(1)

    @pl.when(k == 0)
    def _():
        sum_ref[...] = jnp.zeros_like(sum_ref)
        sumsq_ref[...] = jnp.zeros_like(sumsq_ref)

    x = x_ref[...].astype(jnp.float32)
    if n_total % n_blk != 0:
        # Mask rows of the ragged last batch block.
        row = k * n_blk + jax.lax.broadcasted_iota(jnp.int32, x.shape, 0)
        x = jnp.where(row < n_total, x, 0.0)
    sum_ref[...] += jnp.sum(x, axis=0, keepdims=True)
    sumsq_ref[...] += jnp.sum(x * x, axis=0, keepdims=True)

    @pl.when(k == pl.num_programs(1) - 1)
    def _():
        mean = sum_ref[...] * inv_n
        var = sumsq_ref[...] * inv_n - mean * mean
        o_ref[...] = var.astype(o_ref.dtype)


def variance_score(batch: jax.Array, *, _force_tiling=None) -> jax.Array:
    """Pallas equivalent of VarianceScore.forward.

    batch: (N, *rest)  -> returns array of shape rest with the per-element
    population variance over the leading axis.
    """
    n = batch.shape[0]
    rest = batch.shape[1:]
    f = 1
    for d in rest:
        f *= d

    x2d = batch.reshape(n, f)
    itemsize = jnp.dtype(batch.dtype).itemsize

    # Pad only when the feature axis is not lane-aligned (padding the whole
    # (N, F) slab roughly doubles HBM traffic for a mem-bound kernel).
    if f % _LANE != 0:
        f_eff = pl.cdiv(f, _LANE) * _LANE
        x2d = jnp.pad(x2d, ((0, 0), (0, f_eff - f)))
    else:
        f_eff = f

    vmem_budget, vmem_limit = _vmem_budget_and_limit()
    if _force_tiling is not None:
        tile_f, n_blk = _force_tiling
    else:
        tile_f, n_blk = _select_tiling(n, f_eff, itemsize, vmem_budget)

    inv_n = 1.0 / float(n)
    f_tiles = pl.cdiv(f_eff, tile_f)

    if n_blk >= n:
        # Whole batch axis resident per tile: 1-D grid over feature tiles.
        kernel = functools.partial(_var_kernel_full_batch, inv_n=inv_n)
        grid_spec = pltpu.PrefetchScalarGridSpec(
            num_scalar_prefetch=0,
            grid=(f_tiles,),
            in_specs=[pl.BlockSpec((n, tile_f), lambda j: (0, j))],
            out_specs=pl.BlockSpec((1, tile_f), lambda j: (0, j)),
        )
        dim_sem = ("parallel",)
    else:
        # Large batch: feature tiles parallel, batch-axis reduction last.
        n_steps = pl.cdiv(n, n_blk)
        kernel = functools.partial(_var_kernel_blocked_batch,
                                   inv_n=inv_n, n_total=n, n_blk=n_blk)
        grid_spec = pltpu.PrefetchScalarGridSpec(
            num_scalar_prefetch=0,
            grid=(f_tiles, n_steps),
            in_specs=[pl.BlockSpec((n_blk, tile_f), lambda j, k: (k, j))],
            out_specs=pl.BlockSpec((1, tile_f), lambda j, k: (0, j)),
            scratch_shapes=[pltpu.VMEM((1, tile_f), jnp.float32),
                            pltpu.VMEM((1, tile_f), jnp.float32)],
        )
        dim_sem = ("parallel", "arbitrary")

    out2d = pl.pallas_call(
        kernel,
        out_shape=jax.ShapeDtypeStruct((1, f_eff), batch.dtype),
        grid_spec=grid_spec,
        compiler_params=pltpu.CompilerParams(
            dimension_semantics=dim_sem,
            vmem_limit_bytes=vmem_limit,
        ),
    )(x2d)

    return out2d[0, :f].reshape(rest)


def _reference(batch: jax.Array) -> jax.Array:
    avg_b = jnp.mean(batch, axis=0, keepdims=True)
    return jnp.mean((batch - avg_b) ** 2, axis=0)


if __name__ == "__main__":
    key = jax.random.PRNGKey(0)
    k1, k2 = jax.random.split(key)

    # Shapes implied by the module: NCHW.
    x = jax.random.normal(k1, (2, 4, 16, 16), dtype=jnp.float32)
    out = jax.block_until_ready(variance_score(x))
    ref = _reference(x)
    assert out.shape == ref.shape == (4, 16, 16), (out.shape, ref.shape)
    assert jnp.allclose(out, ref, atol=1e-6, rtol=1e-6), "mismatch vs reference"

    # Exercise the large-batch path (blocked N axis, sum/sumsq accumulators,
    # ragged last batch block) with a forced small tiling.
    x2 = jax.random.normal(k2, (37, 4, 16, 16), dtype=jnp.float32)
    out2 = jax.block_until_ready(variance_score(x2, _force_tiling=(256, 16)))
    ref2 = _reference(x2)
    assert out2.shape == ref2.shape == (4, 16, 16)
    assert jnp.allclose(out2, ref2, atol=1e-5, rtol=1e-5), "blocked-N mismatch"

    print("KERNEL_OK")
</pallas_src>

<mosaic_0001>
module attributes {stable_mosaic.version = 11 : i64} {
  func.func @_var_kernel_full_batch(%arg0: i32, %arg1: memref<2x512xf32, #tpu.memory_space<vmem>>, %arg2: memref<1x512xf32, #tpu.memory_space<vmem>>) attributes {dimension_semantics = [#tpu.dimension_semantics<parallel>], iteration_bounds = array<i64: 2>, scalar_prefetch = 0 : i64, scratch_operands = 0 : i64, tpu.core_type = #tpu.core_type<tc>, window_params = [{transform_indices = @transform_0, window_bounds = array<i64: 2, 512>}, {transform_indices = @transform_1, window_bounds = array<i64: 1, 512>}]} {
    %c0 = arith.constant 0 : index
    %c0_0 = arith.constant 0 : index
    %0 = vector.load %arg1[%c0, %c0_0] : memref<2x512xf32, #tpu.memory_space<vmem>>, vector<2x512xf32>
    %cst = arith.constant dense<0.000000e+00> : vector<512xf32>
    %1 = vector.multi_reduction <add>, %0, %cst [0] : vector<2x512xf32> to vector<512xf32>
    %2 = vector.shape_cast %1 : vector<512xf32> to vector<1x512xf32>
    %cst_1 = arith.constant 5.000000e-01 : f32
    %3 = vector.broadcast %cst_1 : f32 to vector<1x512xf32>
    %4 = arith.mulf %2, %3 : vector<1x512xf32>
    %5 = vector.broadcast %4 : vector<1x512xf32> to vector<2x512xf32>
    %6 = arith.subf %0, %5 : vector<2x512xf32>
    %7 = arith.mulf %6, %6 : vector<2x512xf32>
    %cst_2 = arith.constant dense<0.000000e+00> : vector<512xf32>
    %8 = vector.multi_reduction <add>, %7, %cst_2 [0] : vector<2x512xf32> to vector<512xf32>
    %9 = vector.shape_cast %8 : vector<512xf32> to vector<1x512xf32>
    %cst_3 = arith.constant 5.000000e-01 : f32
    %10 = vector.broadcast %cst_3 : f32 to vector<1x512xf32>
    %11 = arith.mulf %9, %10 : vector<1x512xf32>
    %c0_4 = arith.constant 0 : index
    %c0_5 = arith.constant 0 : index
    %12 = vector.load %arg2[%c0_4, %c0_5] : memref<1x512xf32, #tpu.memory_space<vmem>>, vector<1x512xf32>
    tpu.vector_store %arg2[%c0_4, %c0_5], %11 {strides = array<i32>} : memref<1x512xf32, #tpu.memory_space<vmem>>, vector<1x512xf32>,
    return
  }
  func.func @transform_0(%arg0: i32) -> (i32, i32) {
    %c0_i32 = arith.constant 0 : i32
    %c0_i32_0 = arith.constant 0 : i32
    return %c0_i32, %arg0 : i32, i32
  }
  func.func @transform_1(%arg0: i32) -> (i32, i32) {
    %c0_i32 = arith.constant 0 : i32
    %c0_i32_0 = arith.constant 0 : i32
    return %c0_i32, %arg0 : i32, i32
  }
}

</mosaic_0001>

<bundles_post_ra>
// kernel: tpu_custom_call.1
= control target key start
LH: loop header
LB: loop body
LE: loop exit
PB: predicated region body
PF: predicated region fallthrough
CT: control target
= control target key end

     0   :  { %6 = vsyncpa [#allocation3], 0  ;;  %s741_s0 = inlined_call_operand.hbm [shape: f32[2,1024], index: 0, kind: input, shape index: {}]   ;;  %s742_s1 = inlined_call_operand.hbm [shape: f32[1,1024], index: 1, kind: output, shape index: {}]  }
   0x1   :  { %8 = vsyncpa [#allocation3 + $0x1], 0 }
   0x2   :  { %9 = vsyncpa [#allocation4], 0 }
   0x3   :  { %11 = vsyncpa [#allocation4 + $0x1], 0  ;;  %s565_s6 = smov 0   ;;  %s567_s7 = smov 0  }
   0x4   :  { %s569_s8 = smov 0   ;;  %s571_s9 = smov 0  }
   0x5 LB: > { %s586_s10 = sadd.s32 4294967295, %s549_s9   ;;  %s388_s11 = sadd.s32 4294967294, %s549_s9   ;;  %s549_s9 = sphi %s571_s9, %s757_s9   ;;  %s545_s8 = sphi %s569_s8, %s756_s8   ;;  %s541_s7 = sphi %s567_s7, %s755_s7   ;;  %s537_s6 = sphi %s565_s6, %s754_s6  }
   0x6   : > { %s590_s12 = sadd.s32 1, %s549_s9   ;;  %s24_s13 = sadd.s32 1, %s545_s8 }
   0x7   : > { %s21_s14 = ssub.s32 %s549_s9, %s590_s12  ;;  %p31_p0 = scmp.ne.s32.totalorder %s545_s8, %s541_s7 }
   0x8   : > { %p22_p1 = scmp.eq.s32.totalorder %s21_s14, 0  ;;  %p32_p2 = scmp.eq.s32.totalorder %s549_s9, 0 }
   0x9   : > { %p37_p3 = scmp.ne.s32.totalorder %s541_s7, %s537_s6  ;;  %p38_p4 = scmp.eq.s32.totalorder %s586_s10, 0 }
   0xa   : > { %s602_s15 = scalar_select %p22_p1, %s545_s8, %s24_s13  }
   0xb   : > { %p604_p5 = por %p32_p2, %p31_p0  ;;  %p608_p6 = por %p38_p4, %p37_p3 }
   0xc   : > { %p61_p7 = scmp.eq.s32.totalorder %s586_s10, 1  ;;  %p67_p8 = scmp.eq.s32.totalorder %s388_s11, 1 }
   0xd   : > { %p416_p10 = scmp.lt.s32.totalorder %s549_s9, 2  ;;  %s87_s20 = sand.u32 1, %s545_s8  }
   0xe   : > { %p615_p11 = por %p61_p7, %p31_p0  ;;  %p619_p12 = por %p67_p8, %p37_p3 }
   0xf   : > { %s402_s21 = sshll.u32 %s549_s9, 7  ;;  %s391_s22 = sshll.u32 %s87_s20, 3 }
  0x10   : > { %s746_s18 = scalar_select %p615_p11, 1, 0 }
  0x11   : > { %s747_s19 = scalar_select %p619_p12, 1, 0 }
  0x12   : > { %s628_s25 = scalar_lea.hbm %s741_s0, %s402_s21  ;;  %s91_s26 = scalar_lea.vmem [#allocation2], %s391_s22 }
  0x13   : > { %s99_s27 = sshll.u32 %s91_s26, 4  ;;  %p632_p13 = pnand %p416_p10, %p604_p5  ;;  %s636_s27 = int_to_ptr.vmem [resolvable:$true] %s99_s27 }
  0x14   : > { %s88_s29 = scalar_lea.sflag [#allocation3], %s87_s20  ;;  %s453_s30 = scalar_lea.hbm %s628_s25, 128 }
  0x15   : > { %p454_p2 = scmp.ne.s32.totalorder %s628_s25, %s453_s30  ;;  %p455_p3 = pneg %p632_p13 }
  0x16   : > { %s458_s4 = scalar_lea.hbm %s741_s0, 256  ;;  %p459_p5 = scmp.lt.u32.totalorder %s628_s25, %s741_s0 }
  0x17   : > { %p456_p4 = pnand %p455_p3, %p454_p2  ;;  %p460_p8 = scmp.lt.u32.totalorder %s458_s4, %s453_s30 }
  0x18   : > { %p462_p9 = scmp.lt.u32.totalorder %s453_s30, %s628_s25 }
  0x19   : > { %p457_p7 = pneg %p456_p4  ;;  %p461_p10 = por %p460_p8, %p459_p5 }
  0x1b   : > { %p463_p0 = por %p462_p9, %p461_p10 }
  0x1d   : > { %p464_p1 = pnand %p463_p0, %p457_p7 }
  0x1f   : > { %467 = shalt.err (!%p464_p1)
}
  0x20   : > { %s468_s13 = scalar_lea.vmem %s636_s27, 128  ;;  %s551_s14 = smov [#allocation2]  }
  0x21   : > { %p469_p2 = scmp.ne.s32.totalorder %s636_s27, %s468_s13  ;;  %s473_s16 = sshll.u32 %s551_s14, 4  ;;  %s474_s16 = int_to_ptr.vmem [resolvable:$false] %s473_s16 }
  0x22   : > { %s475_s20 = scalar_lea.vmem %s474_s16, 256  ;;  %p476_p11 = scmp.lt.s32.totalorder %s636_s27, %s474_s16 }
  0x23   : > { %p471_p4 = pnand %p469_p2, %p455_p3  ;;  %p477_p5 = scmp.lt.s32.totalorder %s475_s20, %s468_s13 }
  0x25   : > { %p472_p12 = pneg %p471_p4  ;;  %p478_p8 = por %p477_p5, %p476_p11 }
  0x27   : > { %p479_p9 = pnand %p478_p8, %p472_p12 }
  0x29   : > { %482 = shalt.err (!%p479_p9)
}
  0x2a   : > { %411 = dma.hbm_to_vmem [thread:$0]  (!%p632_p13), %s628_s25, 128, %s636_s27, %s88_s29  }
  0x2b   : > { %p749_p0 = scmp.lt.s32.totalorder %s549_s9, 3  ;;  %p750_p1 = scmp.ge.s32.totalorder %s549_s9, 1 }
  0x2d   : > { %p105_p3 = pnand %p750_p1, %p749_p0 }
  0x2e   : > { %s670_s21 = sand.u32 (!%p105_p3), 1, %s541_s7  }
  0x2f   : > { %108 = sbr.rel (%p105_p3) target bundleno = 134 (0x86), region = 24  ;;  %s395_s22 = sshll.u32 (!%p105_p3), %s670_s21, 3 }
  0x30   : > { %s111_s23 = scalar_lea.sflag (!%p105_p3), [#allocation3], %s670_s21  ;;  %s114_s24 = scalar_lea.vmem (!%p105_p3), [#allocation2], %s395_s22 }
  0x36   : > { %528 = dma.done.wait (%p608_p6), %s111_s23, 128  }
  0x37   : > { %530 = vsyncadd (%p608_p6), %s111_s23, 4294967168  ;;  %v141_v0 = vlaneseq  ;;  %v552_v1 = vmov 1983009808   ;;  %v135_v6 = vld [vmem:[%s114_s24] sm:$0xff]  ;;  %vm158_vm0 = vcmask 1041408   ;;  %s396_s17 = sshll.u32 %s670_s21, 2 }
  0x38   : > { %v139_v2 = vunpack.c.l.s4 %v552_v1  ;;  %v137_v7 = vcombine.high %v135_v6, %v135_v6  ;;  %s132_s25 = scalar_lea.vmem [#allocation5], %s396_s17  ;;  %s403_s27 = sshll.u32 %s586_s10, 6 }
  0x39   : > { %v679_v3 = vshrl.u32 %v141_v0, 7  ;;  %s318_s26 = sshll.u32 %s132_s25, 4  ;;  %vm300_vm1 = vcmp.lt.s32.totalorder %v141_v0, 512  ;;  %s699_s30 = scalar_lea.hbm %s742_s1, %s403_s27  ;;  %s694_s26 = int_to_ptr.vmem [resolvable:$true] %s318_s26 }
  0x3a   : > { %v140_v4 = vunpack.c.0.s8 %v139_v2  ;;  %s304_s2 = scalar_lea.sflag [#allocation4], %s670_s21  ;;  %s483_s3 = scalar_lea.vmem %s694_s26, 64 }
  0x3b   : > { %p484_p6 = scmp.ne.s32.totalorder %s694_s26, %s483_s3  ;;  %p751_p11 = scmp.ne.s32.totalorder %s746_s18, 0 }
  0x3c   : > { %v143_v5 = vsub.s32 %v140_v4, %v679_v3  ;;  %s554_s10 = smov [#allocation5]  }
  0x3d   : > { %p485_p12 = pnand %p484_p6, %p751_p11  ;;  %s487_s4 = sshll.u32 %s554_s10, 4  ;;  %s488_s4 = int_to_ptr.vmem [resolvable:$false] %s487_s4 }
  0x3e   : > { %v144_v8 = vrot.slane %v135_v6, %v143_v5  ;;  %v151_v9 = vrot.slane %v137_v7, %v143_v5  ;;  %v553_v7 = vmov 1966171168   ;;  %s489_s5 = scalar_lea.vmem %s488_s4, 128  ;;  %p490_p7 = scmp.lt.s32.totalorder %s694_s26, %s488_s4 }
  0x3f   : > { %p486_p13 = pneg %p485_p12  ;;  %p491_p10 = scmp.lt.s32.totalorder %s489_s5, %s483_s3 }
  0x40   : > { %v152_v10 = vcombine.high %v144_v8, %v144_v8  ;;  %v159_v11 = vsel %vm158_vm0, %v144_v8, 0.0  ;;  %v153_v13 = vcombine.high %v151_v9, %v151_v9  ;;  %v173_v15 = vsel %vm158_vm0, %v151_v9, 0.0 }
  0x41   : > { %v160_v12 = vrot.slane %v159_v11, 4  ;;  %v174_v18 = vrot.slane %v173_v15, 4  ;;  %p492_p2 = por %p491_p10, %p490_p7 }
  0x42   : > { %v166_v14 = vsel %vm158_vm0, %v152_v10, 0.0  ;;  %v180_v19 = vsel %vm158_vm0, %v153_v13, 0.0 }
  0x43   : > { %v161_v16 = vadd.f32 %v160_v12, %v159_v11  ;;  %v167_v17 = vrot.slane %v166_v14, 4  ;;  %v175_v22 = vadd.f32 %v174_v18, %v173_v15  ;;  %v181_v23 = vrot.slane %v180_v19, 4  ;;  %p493_p4 = pnand %p492_p2, %p486_p13 }
  0x45   : > { %v162_v20 = vrot.slane %v161_v16, 2  ;;  %v168_v21 = vadd.f32 %v167_v17, %v166_v14  ;;  %v176_v26 = vrot.slane %v175_v22, 2  ;;  %v182_v27 = vadd.f32 %v181_v23, %v180_v19 }
  0x47   : > { %v163_v24 = vadd.f32 %v162_v20, %v161_v16  ;;  %v169_v25 = vrot.slane %v168_v21, 2  ;;  %v177_v30 = vadd.f32 %v176_v26, %v175_v22  ;;  %v183_v31 = vrot.slane %v182_v27, 2 }
  0x49   : > { %v164_v28 = vrot.slane %v163_v24, 1  ;;  %v170_v29 = vadd.f32 %v169_v25, %v168_v21  ;;  %v178_v34 = vrot.slane %v177_v30, 1  ;;  %v184_v35 = vadd.f32 %v183_v31, %v182_v27 }
  0x4b   : > { %v165_v32 = vadd.f32 %v164_v28, %v163_v24  ;;  %v171_v33 = vrot.slane %v170_v29, 1  ;;  %v179_v37 = vadd.f32 %v178_v34, %v177_v30  ;;  %v185_v38 = vrot.slane %v184_v35, 1 }
  0x4d   : > { %v172_v36 = vadd.f32 %v171_v33, %v170_v29  ;;  %v187_v39 = vmul.f32 0.5, %v165_v32  ;;  %v186_v40 = vadd.f32 %v185_v38, %v184_v35  ;;  %v189_v42 = vmul.f32 0.5, %v179_v37 }
  0x4f   : > { %v188_v41 = vmul.f32 0.5, %v172_v36  ;;  %v190_v43 = vmul.f32 0.5, %v186_v40 }
  0x51   : > { %v195_v44 = vcombine.low %v187_v39, %v188_v41  ;;  %v196_v45 = vcombine.low %v189_v42, %v190_v43 }
  0x53   : > { %v203_v46 = vrot.slane %v195_v44, %v143_v5  ;;  %v210_v47 = vrot.slane %v196_v45, %v143_v5 }
  0x55   : > { %v211_v48 = vcombine.low %v203_v46, %v210_v47 }
  0x57   : > { %v213_v49 = vsub.f32 %v135_v6, %v211_v48 }
  0x59   : > { %v214_v50 = vmul.f32 %v213_v49, %v213_v49 }
  0x5b   : > { %v216_v51 = vcombine.high %v214_v50, %v214_v50  ;;  %v223_v52 = vrot.slane %v214_v50, %v143_v5 }
  0x5d   : > { %v230_v53 = vrot.slane %v216_v51, %v143_v5  ;;  %v231_v54 = vcombine.high %v223_v52, %v223_v52  ;;  %v237_v55 = vsel %vm158_vm0, %v223_v52, 0.0  ;;  %v276_v5 = vunpack.c.l.s4 %v553_v7 }
  0x5e   : > { %v238_v56 = vrot.slane %v237_v55, 4 }
  0x5f   : > { %v232_v57 = vcombine.high %v230_v53, %v230_v53  ;;  %v244_v58 = vsel %vm158_vm0, %v231_v54, 0.0  ;;  %v251_v59 = vsel %vm158_vm0, %v230_v53, 0.0  ;;  %v277_v16 = vunpack.c.0.s8 %v276_v5 }
  0x60   : > { %v239_v60 = vadd.f32 %v238_v56, %v237_v55  ;;  %v245_v61 = vrot.slane %v244_v58, 4  ;;  %v252_v62 = vrot.slane %v251_v59, 4 }
  0x61   : > { %v258_v63 = vsel %vm158_vm0, %v232_v57, 0.0  ;;  %v280_v28 = vsub.s32 %v277_v16, %v679_v3 }
  0x62   : > { %v240_v1 = vrot.slane %v239_v60, 2  ;;  %v246_v2 = vadd.f32 %v245_v61, %v244_v58  ;;  %v253_v4 = vadd.f32 %v252_v62, %v251_v59  ;;  %v259_v6 = vrot.slane %v258_v63, 4 }
  0x64   : > { %v241_v8 = vadd.f32 %v240_v1, %v239_v60  ;;  %v247_v9 = vrot.slane %v246_v2, 2  ;;  %v254_v10 = vrot.slane %v253_v4, 2  ;;  %v260_v11 = vadd.f32 %v259_v6, %v258_v63 }
  0x66   : > { %v242_v12 = vrot.slane %v241_v8, 1  ;;  %v248_v13 = vadd.f32 %v247_v9, %v246_v2  ;;  %v255_v14 = vadd.f32 %v254_v10, %v253_v4  ;;  %v261_v15 = vrot.slane %v260_v11, 2 }
  0x68   : > { %v243_v17 = vadd.f32 %v242_v12, %v241_v8  ;;  %v249_v18 = vrot.slane %v248_v13, 1  ;;  %v256_v19 = vrot.slane %v255_v14, 1  ;;  %v262_v20 = vadd.f32 %v261_v15, %v260_v11 }
  0x6a   : > { %v250_v21 = vadd.f32 %v249_v18, %v248_v13  ;;  %v257_v22 = vadd.f32 %v256_v19, %v255_v14  ;;  %v263_v23 = vrot.slane %v262_v20, 1  ;;  %v265_v24 = vmul.f32 0.5, %v243_v17 }
  0x6c   : > { %v264_v25 = vadd.f32 %v263_v23, %v262_v20  ;;  %v266_v26 = vmul.f32 0.5, %v250_v21  ;;  %v267_v27 = vmul.f32 0.5, %v257_v22 }
  0x6e   : > { %v268_v29 = vmul.f32 0.5, %v264_v25  ;;  %v273_v30 = vcombine.low %v265_v24, %v266_v26 }
  0x70   : > { %v274_v31 = vcombine.low %v267_v27, %v268_v29  ;;  %v281_v32 = vrot.slane %v273_v30, %v280_v28 }
  0x72   : > { %v288_v33 = vrot.slane %v274_v31, %v280_v28 }
  0x74   : > { %v289_v34 = vcombine.low %v281_v32, %v288_v33 }
  0x76   : > { %v296_v35 = vrot.slane %v289_v34, %v280_v28 }
  0x78   : > { %302 = vst.msk [vmem:[%s132_s25] sm:$0xf] %vm300_vm1, %v296_v35 }
  0x79   : > { %496 = shalt.err (!%p493_p4)
}
  0x7a   : > { %s497_s11 = scalar_lea.hbm %s699_s30, 64  ;;  %s501_s16 = scalar_lea.hbm %s742_s1, 128 }
  0x7b   : > { %p498_p5 = scmp.ne.s32.totalorder %s699_s30, %s497_s11  ;;  %p502_p0 = scmp.lt.u32.totalorder %s699_s30, %s742_s1 }
  0x7c   : > { %p503_p1 = scmp.lt.u32.totalorder %s501_s16, %s497_s11  ;;  %p505_p6 = scmp.lt.u32.totalorder %s497_s11, %s699_s30 }
  0x7d   : > { %p499_p8 = pnand %p498_p5, %p751_p11 }
  0x7e   : > { %p504_p3 = por %p503_p1, %p502_p0 }
  0x7f   : > { %p500_p9 = pneg %p499_p8 }
  0x80   : > { %p506_p12 = por %p505_p6, %p504_p3 }
  0x82   : > { %p507_p13 = pnand %p506_p12, %p500_p9 }
  0x84   : > { %510 = shalt.err (!%p507_p13)
}
  0x85   : > { %406 = dma.vmem_to_hbm [thread:$0]  (%p751_p11), %s694_s26, 64, %s699_s30, %s304_s2  }
  0x86 PF: > { %s330_s22 = sand.u32 1, %s537_s6   ;;  %p752_p7 = scmp.ne.s32.totalorder %s747_s19, 0 }
  0x87   : > { %p753_p10 = scmp.ge.s32.totalorder %s549_s9, 2  ;;  %s331_s23 = scalar_lea.sflag [#allocation4], %s330_s22 }
  0x89   : > { %p413_p2 = pnand %p753_p10, %p752_p7 }
  0x8b   : > { %532 = dma.done.wait (!%p413_p2), %s331_s23, 64  }
  0x8c   : > { %534 = vsyncadd (!%p413_p2), %s331_s23, 4294967232  ;;  %p14_p4 = scmp.ge.s32.totalorder %s590_s12, 4   ;;  %s754_s6 = smov %s541_s7 }
  0x8d   : > { %s755_s7 = smov %s545_s8  ;;  %s756_s8 = smov %s602_s15 }
  0x8e   : > { %s757_s9 = smov %s590_s12  ;;  %16 = sbr.rel (!%p14_p4) target bundleno = 5 (0x5), region = 69 }
  0x95   :  { %336 = vsyncpa [#allocation3], 1 }
  0x96   :  { %338 = vsyncpa [#allocation3 + $0x1], 1 }
  0x97   :  { %339 = vsyncpa [#allocation4], 1 }
  0x98   :  { %341 = vsyncpa [#allocation4 + $0x1], 1 }

</bundles_post_ra>
